<compile_context>
chip_gen: v7x
topology: tpu7x:2x2x1
jax: 0.10.0
libtpu: 0.0.40
codegen_flags: <defaults>
</compile_context>

<pallas_src>
import functools

import jax
import jax.numpy as jnp
from jax.experimental import pallas as pl
from jax.experimental.pallas import tpu as pltpu

LANE = 128


def _round_up(x, m):
    return (x + m - 1) // m * m


def _pad2d(a, rows, cols):
    out = jnp.zeros((rows, cols), a.dtype)
    return out.at[: a.shape[0], : a.shape[1]].set(a)


# ---------------------------------------------------------------------------
# Pallas kernels
# ---------------------------------------------------------------------------
def message_kernel(x_ref, w_ref, b_ref, h_ref):
    """h = relu(x @ W_lin + b) for one row tile; stored bf16 for the A@h pass."""
    x = x_ref[...].astype(jnp.float32)
    h = jnp.dot(x, w_ref[...], preferred_element_type=jnp.float32) + b_ref[...]
    h_ref[...] = jnp.maximum(h, 0.0).astype(h_ref.dtype)


def sage_aggregate_update_kernel(x_ref, a_ref, h_ref, dinv_ref,
                                 wx_ref, wm_ref, b_ref, o_ref, acc_ref, *, tk):
    """Tiled aggregation sum_j A[i,j]*h[j] (f32 accumulator) + fused update.

    grid = (row tiles i, contraction tiles k).
    A holds int8 edge counts (exact); cast to bf16 for the MXU.  The exact
    f32 1/deg rescale, GraphSage concat-linear update, ReLU and L2 normalize
    are fused into the k==last finalize.  h is fully VMEM-resident (constant
    index_map) and sliced per k step here, so it is DMA'd only once.
    """
    k = pl.program_id(1)

    @pl.when(k == 0)
    def _init():
        acc_ref[...] = jnp.zeros_like(acc_ref)

    a_blk = a_ref[...].astype(jnp.bfloat16)              # int8 counts -> bf16 (exact)
    h_blk = h_ref[pl.ds(pl.multiple_of(k * tk, tk), tk), :]
    acc_ref[...] += jnp.dot(a_blk, h_blk, preferred_element_type=jnp.float32)

    @pl.when(k == pl.num_programs(1) - 1)
    def _finalize():
        m = acc_ref[...] * dinv_ref[...]                 # exact mean: f32 1/deg
        x = x_ref[...].astype(jnp.float32)
        # update: relu(agg_lin([x, m])) -- concat folded into two matmuls
        u = (jnp.dot(x, wx_ref[...], preferred_element_type=jnp.float32)
             + jnp.dot(m, wm_ref[...], preferred_element_type=jnp.float32)
             + b_ref[...])
        u = jnp.maximum(u, 0.0)
        # F.normalize(p=2): rsqrt on the EUP + one VPU multiply (padded lanes are 0).
        inv = jax.lax.rsqrt(jnp.maximum(jnp.sum(u * u, axis=-1, keepdims=True),
                                        1e-24))
        # GNNStack relu + dropout(p=0, eval) are identities here (u*inv >= 0).
        o_ref[...] = u * inv


def post_mp_kernel(x_ref, w1_ref, b1_ref, w2_ref, b2_ref, o_ref, *, num_classes):
    """post_mp (Linear -> Dropout(eval) -> Linear) + masked log_softmax(dim=1)."""
    h = jnp.dot(x_ref[...], w1_ref[...], preferred_element_type=jnp.float32) + b1_ref[...]
    z = jnp.dot(h, w2_ref[...], preferred_element_type=jnp.float32) + b2_ref[...]
    col = jax.lax.broadcasted_iota(jnp.int32, z.shape, 1)
    valid = col < num_classes
    z = jnp.where(valid, z, -1e30)                       # mask padded class lanes
    zmax = jnp.max(z, axis=-1, keepdims=True)
    s = z - zmax
    lse = jnp.log(jnp.sum(jnp.where(valid, jnp.exp(s), 0.0),
                          axis=-1, keepdims=True))
    o_ref[...] = s - lse


# ---------------------------------------------------------------------------
# Wrappers (pallas_call with real grids / BlockSpecs)
# ---------------------------------------------------------------------------
def message_pass(x_bf16, wlin, blin, *, tm):
    n_pad, fin = x_bf16.shape
    fout = wlin.shape[1]
    assert n_pad % tm == 0
    return pl.pallas_call(
        message_kernel,
        out_shape=jax.ShapeDtypeStruct((n_pad, fout), jnp.bfloat16),
        grid_spec=pltpu.PrefetchScalarGridSpec(
            num_scalar_prefetch=0,
            grid=(n_pad // tm,),
            in_specs=[pl.BlockSpec((tm, fin), lambda i: (i, 0)),
                      pl.BlockSpec((fin, fout), lambda i: (0, 0)),
                      pl.BlockSpec((1, fout), lambda i: (0, 0))],
            out_specs=pl.BlockSpec((tm, fout), lambda i: (i, 0)),
        ),
        compiler_params=pltpu.CompilerParams(
            dimension_semantics=("parallel",)),
    )(x_bf16, wlin, blin)


def sage_layer(x_bf16, a_int8, h_bf16, deg_inv, wagg_x, wagg_m, bagg, *, tm, tk):
    n_pad, fin = x_bf16.shape
    fout = wagg_m.shape[1]
    assert n_pad % tm == 0 and n_pad % tk == 0
    assert h_bf16.shape == (n_pad, fout) and a_int8.shape == (n_pad, n_pad)
    kernel = functools.partial(sage_aggregate_update_kernel, tk=tk)
    cost = pl.CostEstimate(
        flops=2 * n_pad * n_pad * fout + 4 * n_pad * fin * fout,
        transcendentals=n_pad,
        bytes_accessed=(n_pad * n_pad * 1          # int8 A (dominant stream)
                        + n_pad * fout * 2         # h: resident, read once
                        + n_pad * fin * 2          # x: bf16 row tiles
                        + n_pad * fout * 4         # output
                        + n_pad * 4),              # 1/deg
    )
    # TODO(synk): add pipeline_mode=pl.Buffered(1) on the grid-invariant specs
    # (weights/bias/resident h) when scaling tiles up on v7x's 64 MiB VMEM.
    return pl.pallas_call(
        kernel,
        out_shape=jax.ShapeDtypeStruct((n_pad, fout), jnp.float32),
        grid_spec=pltpu.PrefetchScalarGridSpec(
            num_scalar_prefetch=0,
            grid=(n_pad // tm, n_pad // tk),
            in_specs=[
                pl.BlockSpec((tm, fin), lambda i, k: (i, 0)),      # x row tile (bf16)
                pl.BlockSpec((tm, tk), lambda i, k: (i, k)),       # A tile (int8 counts)
                pl.BlockSpec((n_pad, fout), lambda i, k: (0, 0)),  # h resident (bf16)
                pl.BlockSpec((tm, 1), lambda i, k: (i, 0)),        # 1/deg (f32)
                pl.BlockSpec((fin, fout), lambda i, k: (0, 0)),    # W_agg (x part)
                pl.BlockSpec((fout, fout), lambda i, k: (0, 0)),   # W_agg (m part)
                pl.BlockSpec((1, fout), lambda i, k: (0, 0)),      # bias
            ],
            out_specs=pl.BlockSpec((tm, fout), lambda i, k: (i, 0)),
            scratch_shapes=[pltpu.VMEM((tm, fout), jnp.float32)],
        ),
        compiler_params=pltpu.CompilerParams(
            dimension_semantics=("parallel", "arbitrary"),
            # sized to stay inside v7x's 64 MiB physical VMEM; raise to
            # ~96-112 MiB on v5e/v6e for TK>=2048 / very large resident h.
            vmem_limit_bytes=48 * 1024 * 1024,
        ),
        cost_estimate=cost,
    )(x_bf16, a_int8, h_bf16, deg_inv, wagg_x, wagg_m, bagg)


def post_mp(x, w1, b1, w2, b2, *, num_classes, tm):
    n_pad, hid = x.shape
    out_pad = w2.shape[1]
    assert n_pad % tm == 0
    kernel = functools.partial(post_mp_kernel, num_classes=num_classes)
    return pl.pallas_call(
        kernel,
        out_shape=jax.ShapeDtypeStruct((n_pad, out_pad), jnp.float32),
        grid_spec=pltpu.PrefetchScalarGridSpec(
            num_scalar_prefetch=0,
            grid=(n_pad // tm,),
            in_specs=[pl.BlockSpec((tm, hid), lambda i: (i, 0)),
                      pl.BlockSpec((hid, hid), lambda i: (0, 0)),
                      pl.BlockSpec((1, hid), lambda i: (0, 0)),
                      pl.BlockSpec((hid, out_pad), lambda i: (0, 0)),
                      pl.BlockSpec((1, out_pad), lambda i: (0, 0))],
            out_specs=pl.BlockSpec((tm, out_pad), lambda i: (i, 0)),
        ),
        compiler_params=pltpu.CompilerParams(
            dimension_semantics=("parallel",)),
    )(x, w1, b1, w2, b2)


def gnn_stack_forward(x_pad, a_int8, deg_inv, padded_params, *, num_nodes,
                      num_classes, tm, tk):
    """Full GNNStack forward (GraphSage variant, eval mode) on padded operands."""
    x = x_pad
    for layer in padded_params["convs"]:
        xb = x.astype(jnp.bfloat16)          # halve the x read stream; accum stays f32
        h = message_pass(xb, layer["wlin"], layer["blin"], tm=tm)
        x = sage_layer(xb, a_int8, h, deg_inv, layer["wagg_x"], layer["wagg_m"],
                       layer["bagg"], tm=tm, tk=tk)
    out_pad = post_mp(x, padded_params["w_p1"], padded_params["b_p1"],
                      padded_params["w_p2"], padded_params["b_p2"],
                      num_classes=num_classes, tm=tm)
    return out_pad[:num_nodes, :num_classes]


# ---------------------------------------------------------------------------
# Deterministic parameter / input construction
# ---------------------------------------------------------------------------
def make_params(key, input_dim, hidden_dim, output_dim, num_layers):
    params = {"convs": []}
    dims_in = [input_dim] + [hidden_dim] * (num_layers - 1)
    for l in range(num_layers):
        fin, fout = dims_in[l], hidden_dim
        key, k1, k2, k3 = jax.random.split(key, 4)
        wlin = 0.1 * jax.random.normal(k1, (fin, fout), jnp.float32)
        wagg = 0.1 * jax.random.normal(k2, (fin + fout, fout), jnp.float32)
        params["convs"].append({
            "wlin": wlin,
            "blin": 0.01 * jax.random.normal(k3, (1, fout), jnp.float32),
            "wagg_x": wagg[:fin, :],
            "wagg_m": wagg[fin:, :],
            "bagg": jnp.zeros((1, fout), jnp.float32),
        })
    key, k1, k2, k3, k4 = jax.random.split(key, 5)
    params["w_p1"] = 0.1 * jax.random.normal(k1, (hidden_dim, hidden_dim), jnp.float32)
    params["b_p1"] = 0.01 * jax.random.normal(k2, (1, hidden_dim), jnp.float32)
    params["w_p2"] = 0.1 * jax.random.normal(k3, (hidden_dim, output_dim), jnp.float32)
    params["b_p2"] = 0.01 * jax.random.normal(k4, (1, output_dim), jnp.float32)
    return params


def pad_params(params, fpad):
    padded = {"convs": []}
    for layer in params["convs"]:
        padded["convs"].append({
            "wlin": _pad2d(layer["wlin"], fpad, fpad),
            "blin": _pad2d(layer["blin"], 1, fpad),
            "wagg_x": _pad2d(layer["wagg_x"], fpad, fpad),
            "wagg_m": _pad2d(layer["wagg_m"], fpad, fpad),
            "bagg": _pad2d(layer["bagg"], 1, fpad),
        })
    padded["w_p1"] = _pad2d(params["w_p1"], fpad, fpad)
    padded["b_p1"] = _pad2d(params["b_p1"], 1, fpad)
    padded["w_p2"] = _pad2d(params["w_p2"], fpad, fpad)
    padded["b_p2"] = _pad2d(params["b_p2"], 1, fpad)
    return padded


def build_adjacency(edge_index, num_nodes):
    """int8 edge-count adjacency + exact f32 1/deg (matches PyG scatter-mean)."""
    # TODO(synk): replace the dense NxN adjacency with a scalar-prefetched
    # neighbor-list / block-sparse gather (CSR offsets via PrefetchScalarGridSpec)
    # for large sparse graphs -- only that change leaves the N^2 HBM roofline.
    src, dst = edge_index
    counts = jnp.zeros((num_nodes, num_nodes), jnp.float32)
    counts = counts.at[dst, src].add(1.0)                 # edge j->i counted at [i, j]
    deg = jnp.sum(counts, axis=1, keepdims=True)
    deg_inv = 1.0 / jnp.maximum(deg, 1.0)
    return counts.astype(jnp.int8), deg_inv


def reference_forward(x, a_mean, params):
    """Pure-JAX f32 reference matching the PyTorch module (eval mode)."""
    for layer in params["convs"]:
        h = jax.nn.relu(x @ layer["wlin"] + layer["blin"])
        m = a_mean @ h
        u = jax.nn.relu(x @ layer["wagg_x"] + m @ layer["wagg_m"] + layer["bagg"])
        norm = jnp.sqrt(jnp.sum(u * u, axis=-1, keepdims=True))
        x = u / jnp.maximum(norm, 1e-12)
        x = jax.nn.relu(x)
    z = x @ params["w_p1"] + params["b_p1"]
    z = z @ params["w_p2"] + params["b_p2"]
    return jax.nn.log_softmax(z, axis=1)


if __name__ == "__main__":
    # Small shapes consistent with the module: graph with N nodes.
    N, INPUT_DIM, HIDDEN_DIM, OUTPUT_DIM, NUM_LAYERS = 16, 8, 32, 4, 2

    # Lane-pad feature dims to 128; pad N to 256 so the aggregation grid is a
    # real 2x2 (row, contraction) grid (exercises the f32 accumulator and gives
    # v7x's two TensorCores balanced row tiles).  TM=TK=128 is for this toy N
    # only; raise to 512+ for real graphs (int8 A tile 512x512 = 256 KiB).
    F_PAD = LANE
    TM = TK = 128
    N_PAD = max(_round_up(N, TM), 2 * TM)

    key = jax.random.PRNGKey(0)
    key, kx = jax.random.split(key)
    x = jax.random.normal(kx, (N, INPUT_DIM), jnp.float32)

    # Deterministic ring graph: edges (i -> i+1) and (i -> i-1), 2N edges.
    idx = jnp.arange(N)
    src = jnp.concatenate([idx, idx])
    dst = jnp.concatenate([(idx + 1) % N, (idx - 1) % N])
    edge_index = jnp.stack([src, dst])                     # [2, 2N]

    a_int8, deg_inv = build_adjacency(edge_index, N)
    a_mean = a_int8.astype(jnp.float32) * deg_inv          # f32 reference operand

    params = make_params(key, INPUT_DIM, HIDDEN_DIM, OUTPUT_DIM, NUM_LAYERS)

    # Padded operands for the kernels (padded A columns/rows are zero, so
    # padded nodes never contribute to valid rows).
    x_pad = _pad2d(x, N_PAD, F_PAD)
    a_pad = _pad2d(a_int8, N_PAD, N_PAD)
    dinv_pad = _pad2d(deg_inv, N_PAD, 1)
    padded_params = pad_params(params, F_PAD)

    out = gnn_stack_forward(x_pad, a_pad, dinv_pad, padded_params,
                            num_nodes=N, num_classes=OUTPUT_DIM, tm=TM, tk=TK)
    jax.block_until_ready(out)

    ref = reference_forward(x, a_mean, params)

    assert out.shape == (N, OUTPUT_DIM)
    # rows of log_softmax must exp-sum to 1
    assert bool(jnp.all(jnp.abs(jnp.sum(jnp.exp(out), axis=1) - 1.0) < 1e-3))
    # match the f32 reference (bf16 x/h streaming introduces tiny error;
    # the int8-counts + f32 1/deg aggregation itself is exact)
    assert bool(jnp.allclose(out, ref, atol=5e-2, rtol=5e-2))
    print("KERNEL_OK")
</pallas_src>

<mosaic_0001>
module attributes {stable_mosaic.version = 11 : i64} {
  func.func @message_kernel(%arg0: i32, %arg1: memref<128x128xbf16, #tpu.memory_space<vmem>>, %arg2: memref<128x128xf32, #tpu.memory_space<vmem>>, %arg3: memref<1x128xf32, #tpu.memory_space<vmem>>, %arg4: memref<128x128xbf16, #tpu.memory_space<vmem>>) attributes {dimension_semantics = [#tpu.dimension_semantics<parallel>], iteration_bounds = array<i64: 2>, scalar_prefetch = 0 : i64, scratch_operands = 0 : i64, tpu.core_type = #tpu.core_type<tc>, window_params = [{transform_indices = @transform_0, window_bounds = array<i64: 128, 128>}, {pipeline_mode = #tpu.pipeline_mode<synchronous>, transform_indices = @transform_1, window_bounds = array<i64: 128, 128>}, {pipeline_mode = #tpu.pipeline_mode<synchronous>, transform_indices = @transform_2, window_bounds = array<i64: 1, 128>}, {transform_indices = @transform_3, window_bounds = array<i64: 128, 128>}]} {
    %c0 = arith.constant 0 : index
    %c0_0 = arith.constant 0 : index
    %0 = vector.load %arg1[%c0, %c0_0] : memref<128x128xbf16, #tpu.memory_space<vmem>>, vector<128x128xbf16>
    %1 = arith.extf %0 : vector<128x128xbf16> to vector<128x128xf32>
    %c0_1 = arith.constant 0 : index
    %c0_2 = arith.constant 0 : index
    %2 = vector.load %arg2[%c0_1, %c0_2] : memref<128x128xf32, #tpu.memory_space<vmem>>, vector<128x128xf32>
    %cst = arith.constant dense<0.000000e+00> : vector<128x128xf32>
    %3 = tpu.matmul %1, %2, %cst {dimension_numbers = #tpu.dot_dimension_numbers<[1], [0], [0], [1], [0, 0, 1, 1], [], []>} : vector<128x128xf32>, vector<128x128xf32>, vector<128x128xf32> -> vector<128x128xf32>
    %c0_3 = arith.constant 0 : index
    %c0_4 = arith.constant 0 : index
    %4 = vector.load %arg3[%c0_3, %c0_4] : memref<1x128xf32, #tpu.memory_space<vmem>>, vector<1x128xf32>
    %5 = vector.broadcast %4 : vector<1x128xf32> to vector<128x128xf32>
    %6 = arith.addf %3, %5 : vector<128x128xf32>
    %cst_5 = arith.constant 0.000000e+00 : f32
    %7 = vector.broadcast %cst_5 : f32 to vector<128x128xf32>
    %8 = arith.maximumf %6, %7 : vector<128x128xf32>
    %9 = arith.truncf %8 : vector<128x128xf32> to vector<128x128xbf16>
    %c0_6 = arith.constant 0 : index
    %c0_7 = arith.constant 0 : index
    %10 = vector.load %arg4[%c0_6, %c0_7] : memref<128x128xbf16, #tpu.memory_space<vmem>>, vector<128x128xbf16>
    tpu.vector_store %arg4[%c0_6, %c0_7], %9 {strides = array<i32>} : memref<128x128xbf16, #tpu.memory_space<vmem>>, vector<128x128xbf16>,
    return
  }
  func.func @transform_0(%arg0: i32) -> (i32, i32) {
    %c0_i32 = arith.constant 0 : i32
    %c0_i32_0 = arith.constant 0 : i32
    return %arg0, %c0_i32 : i32, i32
  }
  func.func @transform_1(%arg0: i32) -> (i32, i32) {
    %c0_i32 = arith.constant 0 : i32
    %c0_i32_0 = arith.constant 0 : i32
    %c0_i32_1 = arith.constant 0 : i32
    return %c0_i32, %c0_i32_0 : i32, i32
  }
  func.func @transform_2(%arg0: i32) -> (i32, i32) {
    %c0_i32 = arith.constant 0 : i32
    %c0_i32_0 = arith.constant 0 : i32
    %c0_i32_1 = arith.constant 0 : i32
    return %c0_i32, %c0_i32_0 : i32, i32
  }
  func.func @transform_3(%arg0: i32) -> (i32, i32) {
    %c0_i32 = arith.constant 0 : i32
    %c0_i32_0 = arith.constant 0 : i32
    return %arg0, %c0_i32 : i32, i32
  }
}

</mosaic_0001>

<bundles_post_ra>
// kernel: tpu_custom_call.1
= control target key start
LH: loop header
LB: loop body
LE: loop exit
PB: predicated region body
PF: predicated region fallthrough
CT: control target
= control target key end

     0   :  { %8 = vsyncpa [#allocation3], 0  ;;  %s1323_s0 = inlined_call_operand.hbm [shape: bf16[256,128], index: 0, kind: input, shape index: {}]   ;;  %s1324_s1 = inlined_call_operand.hbm [shape: f32[128,128], index: 1, kind: input, shape index: {}]   ;;  %s1325_s2 = inlined_call_operand.vmem [shape: f32[1,128], index: 2, kind: input, shape index: {}]   ;;  %s1326_s3 = inlined_call_operand.hbm [shape: bf16[256,128], index: 3, kind: output, shape index: {}]  }
   0x1   :  { %10 = vsyncpa [#allocation3 + $0x1], 0 }
   0x2   :  { %11 = vsyncpa [#allocation6], 0 }
   0x3   :  { %12 = vsyncpa [#allocation4], 0 }
   0x4   :  { %14 = vsyncpa [#allocation4 + $0x1], 0  ;;  %s1094_s12 = smov 0   ;;  %s1096_s13 = smov 0  }
   0x5   :  { %s1098_s14 = smov 0   ;;  %s1100_s15 = smov 0  }
   0x6 LB: > { %s1115_s16 = sadd.s32 4294967295, %s1063_s15   ;;  %s599_s17 = sadd.s32 4294967294, %s1063_s15   ;;  %s1063_s15 = sphi %s1100_s15, %s1346_s15   ;;  %s1059_s14 = sphi %s1098_s14, %s1345_s14   ;;  %s1055_s13 = sphi %s1096_s13, %s1344_s13   ;;  %s1051_s12 = sphi %s1094_s12, %s1343_s12  }
   0x7   : > { %p40_p0 = scmp.ne.s32.totalorder %s1055_s13, %s1051_s12  ;;  %p1327_p1 = scmp.eq.s32.totalorder %s1115_s16, 0 }
   0x8   : > { %p112_p3 = scmp.eq.s32.totalorder %s599_s17, 1  ;;  %p600_p5 = scmp.ge.s32.totalorder %s1063_s15, 1 }
   0x9   : > { %p1124_p4 = por %p1327_p1, %p40_p0  ;;  %p119_p7 = scmp.lt.s32.totalorder %s1063_s15, 3 }
   0xa   : > { %p1129_p6 = por %p112_p3, %p40_p0  ;;  %s1065_s21 = smov [#allocation5]  }
   0xb   : > { %s1330_s18 = scalar_select %p1124_p4, 1, 0 }
   0xc   : > { %s1331_s19 = scalar_select %p1129_p6, 1, 0 }
   0xd   : > { %p1134_p8 = pnand %p600_p5, %p119_p7  ;;  %s131_s22 = sshll.u32 %s1065_s21, 4  ;;  %s1138_s22 = int_to_ptr.vmem [resolvable:$true] %s131_s22 }
   0xe   : > { %s1150_s24 = sadd.s32 1, %s1063_s15   ;;  %s27_s25 = sadd.s32 1, %s1059_s14 }
   0xf   : > { %s1332_s20 = scalar_select %p1134_p8, 1, 0 }
  0x10   : > { %p880_p9 = pneg %p1134_p8  ;;  %s24_s26 = ssub.s32 %s1063_s15, %s1150_s24 }
  0x11   : > { %s935_s29 = scalar_lea.hbm %s1324_s1, 2048 }
  0x12   : > { %p1145_p11 = pnand %p880_p9, %p1327_p1  ;;  %p936_p12 = scmp.ne.s32.totalorder %s1324_s1, %s935_s29 }
  0x13   : > { %p942_p5 = scmp.lt.u32.totalorder %s935_s29, %s1324_s1 }
  0x14   : > { %p937_p13 = pneg %p1145_p11 }
  0x16   : > { %p938_p0 = pnand %p937_p13, %p936_p12 }
  0x18   : > { %p939_p3 = pneg %p938_p0 }
  0x1a   : > { %p944_p7 = pnand %p942_p5, %p939_p3 }
  0x1c   : > { %947 = shalt.err (!%p944_p7)
}
  0x1d   : > { %s948_s7 = scalar_lea.vmem %s1138_s22, 2048  ;;  %p956_p2 = scmp.lt.s32.totalorder %s1138_s22, %s1138_s22 }
  0x1e   : > { %p949_p9 = scmp.ne.s32.totalorder %s1138_s22, %s948_s7  ;;  %p957_p6 = scmp.lt.s32.totalorder %s948_s7, %s948_s7 }
  0x20   : > { %p951_p10 = pnand %p949_p9, %p937_p13  ;;  %p958_p4 = por %p957_p6, %p956_p2 }
  0x22   : > { %p952_p1 = pneg %p951_p10 }
  0x24   : > { %p959_p8 = pnand %p958_p4, %p952_p1 }
  0x26   : > { %962 = shalt.err (!%p959_p8)
}
  0x27   : > { %s1066_s8 = smov 128   ;;  %s1067_s9 = smov 8  }
  0x28   : > { %883 = dma.hbm_to_vmem [thread:$0]  (!%p1145_p11), %s1324_s1, 2048, %s1138_s22, [#allocation6], %s1066_s8, %s1066_s8, %s1067_s9  }
  0x29   : > { %p25_p2 = scmp.eq.s32.totalorder %s24_s26, 0  ;;  %p34_p1 = scmp.ne.s32.totalorder %s1059_s14, %s1055_s13 }
  0x2a   : > { %p35_p4 = scmp.eq.s32.totalorder %s1063_s15, 0  ;;  %p893_p6 = scmp.lt.s32.totalorder %s1063_s15, 2 }
  0x2b   : > { %s1181_s17 = scalar_select %p25_p2, %s1059_s14, %s27_s25  }
  0x2c   : > { %p36_p8 = por %p35_p4, %p34_p1  ;;  %p1334_p10 = scmp.eq.s32.totalorder %s1115_s16, 1 }
  0x2d   : > { %s148_s27 = sand.u32 1, %s1059_s14   ;;  %s632_s28 = sshll.u32 %s1063_s15, 10 }
  0x2e   : > { %p1185_p12 = por %p1334_p10, %p34_p1  ;;  %s603_s29 = sshll.u32 %s148_s27, 6 }
  0x2f   : > { %s1194_s4 = scalar_lea.hbm %s1323_s0, %s632_s28  ;;  %s152_s22 = scalar_lea.vmem [#allocation2], %s603_s29 }
  0x30   : > { %s159_s25 = sshll.u32 %s152_s22, 4  ;;  %p1196_p11 = pnand %p893_p6, %p36_p8  ;;  %s1200_s25 = int_to_ptr.vmem [resolvable:$true] %s159_s25 }
  0x31   : > { %s1202_s5 = scalar_lea.sflag [#allocation3], %s148_s27  ;;  %s963_s6 = scalar_lea.hbm %s1194_s4, 1024 }
  0x32   : > { %p964_p13 = scmp.ne.s32.totalorder %s1194_s4, %s963_s6  ;;  %p965_p0 = pneg %p1196_p11 }
  0x33   : > { %s968_s9 = scalar_lea.hbm %s1323_s0, 2048  ;;  %p969_p7 = scmp.lt.u32.totalorder %s1194_s4, %s1323_s0 }
  0x34   : > { %p966_p3 = pnand %p965_p0, %p964_p13  ;;  %p970_p9 = scmp.lt.u32.totalorder %s968_s9, %s963_s6 }
  0x35   : > { %p972_p1 = scmp.lt.u32.totalorder %s963_s6, %s1194_s4 }
  0x36   : > { %p967_p5 = pneg %p966_p3  ;;  %p971_p2 = por %p970_p9, %p969_p7 }
  0x38   : > { %p973_p4 = por %p972_p1, %p971_p2 }
  0x3a   : > { %p974_p6 = pnand %p973_p4, %p967_p5 }
  0x3c   : > { %977 = shalt.err (!%p974_p6)
}
  0x3d   : > { %s978_s27 = scalar_lea.vmem %s1200_s25, 1024  ;;  %s1068_s28 = smov [#allocation2]  }
  0x3e   : > { %p979_p8 = scmp.ne.s32.totalorder %s1200_s25, %s978_s27  ;;  %s983_s29 = sshll.u32 %s1068_s28, 4  ;;  %s984_s29 = int_to_ptr.vmem [resolvable:$false] %s983_s29 }
  0x3f   : > { %s985_s23 = scalar_lea.vmem %s984_s29, 2048  ;;  %p986_p3 = scmp.lt.s32.totalorder %s1200_s25, %s984_s29 }
  0x40   : > { %p981_p10 = pnand %p979_p8, %p965_p0  ;;  %p987_p7 = scmp.lt.s32.totalorder %s985_s23, %s978_s27 }
  0x42   : > { %p982_p13 = pneg %p981_p10  ;;  %p988_p9 = por %p987_p7, %p986_p3 }
  0x44   : > { %p989_p2 = pnand %p988_p9, %p982_p13 }
  0x46   : > { %992 = shalt.err (!%p989_p2)
}
  0x47   : > { %s1069_s30 = smov 64   ;;  %s1070_s22 = smov 4  }
  0x48   : > { %887 = dma.hbm_to_vmem [thread:$0]  (!%p1196_p11), %s1194_s4, 1024, %s1200_s25, %s1202_s5, %s1069_s30, %s1069_s30, %s1070_s22  }
  0x49   : > { %p1337_p0 = scmp.ne.s32.totalorder %s1332_s20, 0 }
  0x4a   : > { %s1233_s6 = sand.u32 (!%p1337_p0), 1, %s1055_s13   ;;  %p1338_p5 = scmp.ne.s32.totalorder (!%p1337_p0), %s1330_s18, 0 }
  0x4b   : > { %171 = sbr.rel (%p1337_p0) target bundleno = 367 (0x16f), region = 32  ;;  %s607_s7 = sshll.u32 (!%p1337_p0), %s1233_s6, 6 }
  0x4c   : > { %s174_s8 = scalar_lea.sflag (!%p1337_p0), [#allocation3], %s1233_s6  ;;  %s1239_s9 = scalar_lea.vmem (!%p1337_p0), [#allocation2], %s607_s7 }
  0x52   : > { %1038 = dma.done.wait (%p1338_p5), %s174_s8, 1024  }
  0x53   : > { %1040 = vsyncadd (%p1338_p5), %s174_s8, 4294966272  ;;  %p1339_p11 = scmp.eq.s32.totalorder %s1115_s16, 0 }
  0x55   : > { %1042 = dma.done.wait (%p1339_p11), [#allocation6], 2048   ;;  %p1340_p1 = pmov %p1339_p11 }
  0x56   : > { %v238_v0 = vld [vmem:[#allocation5] sm:$0xff]  ;;  %v239_v1 = vld [vmem:[#allocation5 + $0x8] sm:$0xff]  ;;  %v240_v2 = vld [vmem:[#allocation5 + $0x10] sm:$0xff]  ;;  %s1262_s4 = scalar_lea.vmem [#allocation7], %s607_s7  ;;  %s649_s26 = sshll.u32 %s1115_s16, 10 }
  0x57   : > { %1044 = vsyncadd (%p1340_p1), [#allocation6], 4294965248  ;;  %v824_v3 = vpack.c.bf16 %v239_v1, %v238_v0  ;;  %v241_v4 = vld [vmem:[#allocation5 + $0x18] sm:$0xff]  ;;  %v242_v6 = vld [vmem:[#allocation5 + $0x20] sm:$0xff]  ;;  %s516_s25 = sshll.u32 %s1262_s4, 4  ;;  %s1277_s11 = scalar_lea.hbm %s1326_s3, %s649_s26  ;;  %s1270_s25 = int_to_ptr.vmem [resolvable:$true] %s516_s25 }
  0x58   : > { %v828_v5 = vpack.c.bf16 %v241_v4, %v240_v2  ;;  %v243_v7 = vld [vmem:[#allocation5 + $0x28] sm:$0xff]  ;;  %v651_v9 = vld [vmem:[%s1239_s9] sm:$0xff]   ;;  %v244_v11 = vld [vmem:[#allocation5 + $0x30] sm:$0xff]  ;;  %s503_s16 = scalar_lea.sflag [#allocation4], %s1233_s6  ;;  %s993_s27 = scalar_lea.vmem %s1270_s25, 1024 }
  0x59   : > { %825 = vmatprep.subr.bf16.mxu0 %v824_v3  ;;  %856 = vmatprep.subr.bf16.mxu1 %v824_v3  ;;  %v832_v8 = vpack.c.bf16 %v243_v7, %v242_v6  ;;  %v725_v10 = vld [vmem:[%s1239_s9 + $0x20] sm:$0xff]   ;;  %v245_v12 = vld [vmem:[#allocation5 + $0x38] sm:$0xff]  ;;  %v652_v13 = vunpack.c.l.bf16 %v651_v9  ;;  %v247_v17 = vld [vmem:[#allocation5 + $0x48] sm:$0xff]  ;;  %v653_v30 = vunpack.c.h.bf16 %v651_v9  ;;  %p994_p4 = scmp.ne.s32.totalorder %s1270_s25, %s993_s27  ;;  %s1071_s28 = smov [#allocation7]  }
  0x5a   : > { %827 = vmatpush3.bf16.msra.mxu0 %v824_v3  ;;  %864 = vmatpush3.bf16.msra.mxu1 %v824_v3  ;;  %v668_v14 = vunpack.c.l.bf16 %v725_v10  ;;  %v836_v15 = vpack.c.bf16 %v245_v12, %v244_v11  ;;  %v246_v16 = vld [vmem:[#allocation5 + $0x40] sm:$0xff]  ;;  %v248_v19 = vld [vmem:[#allocation5 + $0x50] sm:$0xff]  ;;  %v249_v20 = vld [vmem:[#allocation5 + $0x58] sm:$0xff]  ;;  %v669_v31 = vunpack.c.h.bf16 %v725_v10  ;;  %s997_s29 = sshll.u32 %s1071_s28, 4  ;;  %s998_s29 = int_to_ptr.vmem [resolvable:$false] %s997_s29 }
  0x5b   : > { %829 = vmatprep.subr.bf16.mxu0 %v828_v5  ;;  %857 = vmatprep.subr.bf16.mxu1 %v828_v5  ;;  %v840_v18 = vpack.c.bf16 %v247_v17, %v246_v16  ;;  %v844_v21 = vpack.c.bf16 %v249_v20, %v248_v19  ;;  %v250_v22 = vld [vmem:[#allocation5 + $0x60] sm:$0xff]  ;;  %v251_v23 = vld [vmem:[#allocation5 + $0x68] sm:$0xff]  ;;  %v252_v25 = vld [vmem:[#allocation5 + $0x70] sm:$0xff]  ;;  %p995_p6 = pnand %p994_p4, %p1185_p12  ;;  %s999_s23 = scalar_lea.vmem %s998_s29, 2048 }
  0x5c   : > { %800 = vmatprep.mubr.f32.mxu0 %v652_v13  ;;  %812 = vmatprep.mubr.f32.mxu1 %v668_v14  ;;  %v848_v24 = vpack.c.bf16 %v251_v23, %v250_v22  ;;  %v253_v26 = vld [vmem:[#allocation5 + $0x78] sm:$0xff]  ;;  %v722_v28 = vld [vmem:[%s1239_s9 + $0x8] sm:$0xff]   ;;  %v723_v34 = vld [vmem:[%s1239_s9 + $0x10] sm:$0xff]   ;;  %p1000_p10 = scmp.lt.s32.totalorder %s1270_s25, %s998_s29  ;;  %p1001_p13 = scmp.lt.s32.totalorder %s999_s23, %s993_s27 }
  0x5d   : > { %v852_v27 = vpack.c.bf16 %v253_v26, %v252_v25  ;;  %v726_v29 = vld [vmem:[%s1239_s9 + $0x28] sm:$0xff]   ;;  %v656_v32 = vunpack.c.l.bf16 %v722_v28  ;;  %v727_v35 = vld [vmem:[%s1239_s9 + $0x30] sm:$0xff]   ;;  %v657_v36 = vunpack.c.h.bf16 %v722_v28  ;;  %v660_v38 = vunpack.c.l.bf16 %v723_v34  ;;  %v724_v40 = vld [vmem:[%s1239_s9 + $0x18] sm:$0xff]   ;;  %p996_p8 = pneg %p995_p6 }
  0x5e   : > { %831 = vmatpush3.bf16.msra.mxu0 %v828_v5  ;;  %865 = vmatpush3.bf16.msra.mxu1 %v828_v5  ;;  %v672_v33 = vunpack.c.l.bf16 %v726_v29  ;;  %v673_v37 = vunpack.c.h.bf16 %v726_v29  ;;  %v676_v39 = vunpack.c.l.bf16 %v727_v35  ;;  %v728_v41 = vld [vmem:[%s1239_s9 + $0x38] sm:$0xff]   ;;  %v661_v42 = vunpack.c.h.bf16 %v723_v34  ;;  %v610_v48 = vld [vmem:[%s1325_s2] ss:$0 sm:$0xff]  ;;  %p1002_p3 = por %p1001_p13, %p1000_p10 }
  0x5f   : > { %833 = vmatprep.subr.bf16.mxu0 %v832_v8  ;;  %858 = vmatprep.subr.bf16.mxu1 %v832_v8  ;;  %v677_v43 = vunpack.c.h.bf16 %v727_v35  ;;  %v664_v44 = vunpack.c.l.bf16 %v724_v40  ;;  %v680_v45 = vunpack.c.l.bf16 %v728_v41  ;;  %v665_v46 = vunpack.c.h.bf16 %v724_v40 }
  0x60   : > { %v681_v47 = vunpack.c.h.bf16 %v728_v41  ;;  %p1003_p7 = pnand %p1002_p3, %p996_p8 }
  0x62   : > { %835 = vmatpush3.bf16.msra.mxu0 %v832_v8  ;;  %866 = vmatpush3.bf16.msra.mxu1 %v832_v8 }
  0x63   : > { %837 = vmatprep.subr.bf16.mxu0 %v836_v15  ;;  %859 = vmatprep.subr.bf16.mxu1 %v836_v15 }
  0x66   : > { %839 = vmatpush3.bf16.msra.mxu0 %v836_v15  ;;  %867 = vmatpush3.bf16.msra.mxu1 %v836_v15 }
  0x67   : > { %841 = vmatprep.subr.bf16.mxu0 %v840_v18  ;;  %860 = vmatprep.subr.bf16.mxu1 %v840_v18 }
  0x6a   : > { %843 = vmatpush3.bf16.msra.mxu0 %v840_v18  ;;  %868 = vmatpush3.bf16.msra.mxu1 %v840_v18 }
  0x6b   : > { %845 = vmatprep.subr.bf16.mxu0 %v844_v21  ;;  %861 = vmatprep.subr.bf16.mxu1 %v844_v21 }
  0x6e   : > { %847 = vmatpush3.bf16.msra.mxu0 %v844_v21  ;;  %869 = vmatpush3.bf16.msra.mxu1 %v844_v21 }
  0x6f   : > { %849 = vmatprep.subr.bf16.mxu0 %v848_v24  ;;  %862 = vmatprep.subr.bf16.mxu1 %v848_v24 }
  0x72   : > { %851 = vmatpush3.bf16.msra.mxu0 %v848_v24  ;;  %870 = vmatpush3.bf16.msra.mxu1 %v848_v24 }
  0x73   : > { %853 = vmatprep.subr.bf16.mxu0 %v852_v27  ;;  %863 = vmatprep.subr.bf16.mxu1 %v852_v27 }
  0x76   : > { %855 = vmatpush3.bf16.msra.mxu0 %v852_v27  ;;  %871 = vmatpush3.bf16.msra.mxu1 %v852_v27 }
  0x79   : > { %801 = vmatmul.mubr.f32.vlgmr.msra.gmra.mrb[0].mxu0 %v653_v30  ;;  %813 = vmatmul.mubr.f32.vlgmr.msra.gmra.mrb[0].mxu1 %v669_v31 }
  0x7a   : > { %803 = vmatprep.mubr.f32.mxu0 %v656_v32  ;;  %815 = vmatprep.mubr.f32.mxu1 %v672_v33 }
  0x7d   : > { %804 = vmatmul.mubr.f32.gmra.mrb[2].mxu0 %v657_v36  ;;  %816 = vmatmul.mubr.f32.gmra.mrb[2].mxu1 %v673_v37 }
  0x7e   : > { %806 = vmatprep.mubr.f32.mxu0 %v660_v38  ;;  %818 = vmatprep.mubr.f32.mxu1 %v676_v39 }
  0x81   : > { %807 = vmatmul.mubr.f32.gmra.mrb[4].mxu0 %v661_v42  ;;  %819 = vmatmul.mubr.f32.gmra.mrb[4].mxu1 %v677_v43 }
  0x82   : > { %809 = vmatprep.mubr.f32.mxu0 %v664_v44  ;;  %821 = vmatprep.mubr.f32.mxu1 %v680_v45 }
  0x85   : > { %810 = vmatmul.mubr.f32.gmra.mrb[6].mxu0 %v665_v46  ;;  %822 = vmatmul.mubr.f32.gmra.mrb[6].mxu1 %v681_v47 }
 0x14c   : > { %v802_v49 = vpop.f32.mrb[0].mxu0  ;;  %v814_v50 = vpop.f32.mrb[0].mxu1 }
 0x14d   : > { %v333_v51 = vadd.f32 %v802_v49, %v610_v48  ;;  %v373_v52 = vadd.f32 %v814_v50, %v610_v48  ;;  %v327_v53 = vpop.f32.mrb[1].mxu0  ;;  %v367_v54 = vpop.f32.mrb[1].mxu1 }
 0x14e   : > { %v328_v55 = vadd.f32 %v610_v48, %v327_v53  ;;  %v368_v56 = vadd.f32 %v610_v48, %v367_v54 }
 0x14f   : > { %v407_v57 = vmax.f32 %v333_v51, 0.0  ;;  %v415_v58 = vmax.f32 %v373_v52, 0.0 }
 0x150   : > { %v406_v59 = vmax.f32 %v328_v55, 0.0  ;;  %v414_v60 = vmax.f32 %v368_v56, 0.0  ;;  %v805_v61 = vpop.f32.mrb[2].mxu0  ;;  %v817_v62 = vpop.f32.mrb[2].mxu1 }
 0x151   : > { %v343_v63 = vadd.f32 %v805_v61, %v610_v48  ;;  %v383_v0 = vadd.f32 %v817_v62, %v610_v48  ;;  %v337_v1 = vpop.f32.mrb[3].mxu0  ;;  %v377_v2 = vpop.f32.mrb[3].mxu1 }
 0x152   : > { %v685_v3 = vpack.c.bf16 %v407_v57, %v406_v59  ;;  %v705_v4 = vpack.c.bf16 %v415_v58, %v414_v60  ;;  %v338_v5 = vadd.f32 %v610_v48, %v337_v1  ;;  %v378_v6 = vadd.f32 %v610_v48, %v377_v2 }
 0x153   : > { %v409_v7 = vmax.f32 %v343_v63, 0.0  ;;  %v417_v8 = vmax.f32 %v383_v0, 0.0 }
 0x154   : > { %686 = vst [vmem:[%s1262_s4] sm:$0xff] %v685_v3   ;;  %732 = vst [vmem:[%s1262_s4 + $0x20] sm:$0xff] %v705_v4   ;;  %v408_v9 = vmax.f32 %v338_v5, 0.0  ;;  %v416_v10 = vmax.f32 %v378_v6, 0.0  ;;  %v808_v11 = vpop.f32.mrb[4].mxu0  ;;  %v820_v12 = vpop.f32.mrb[4].mxu1 }
 0x155   : > { %v353_v13 = vadd.f32 %v808_v11, %v610_v48  ;;  %v393_v14 = vadd.f32 %v820_v12, %v610_v48  ;;  %v347_v15 = vpop.f32.mrb[5].mxu0  ;;  %v387_v16 = vpop.f32.mrb[5].mxu1 }
 0x156   : > { %v690_v17 = vpack.c.bf16 %v409_v7, %v408_v9  ;;  %v710_v18 = vpack.c.bf16 %v417_v8, %v416_v10  ;;  %v348_v19 = vadd.f32 %v610_v48, %v347_v15  ;;  %v388_v20 = vadd.f32 %v610_v48, %v387_v16 }
 0x157   : > { %v411_v21 = vmax.f32 %v353_v13, 0.0  ;;  %v419_v22 = vmax.f32 %v393_v14, 0.0 }
 0x158   : > { %729 = vst [vmem:[%s1262_s4 + $0x8] sm:$0xff] %v690_v17   ;;  %733 = vst [vmem:[%s1262_s4 + $0x28] sm:$0xff] %v710_v18   ;;  %v410_v23 = vmax.f32 %v348_v19, 0.0  ;;  %v418_v24 = vmax.f32 %v388_v20, 0.0  ;;  %v811_v25 = vpop.f32.mrb[6].mxu0  ;;  %v823_v26 = vpop.f32.mrb[6].mxu1 }
 0x159   : > { %v363_v27 = vadd.f32 %v811_v25, %v610_v48  ;;  %v403_v28 = vadd.f32 %v823_v26, %v610_v48  ;;  %v357_v29 = vpop.f32.mrb[7].mxu0  ;;  %v397_v30 = vpop.f32.mrb[7].mxu1 }
 0x15a   : > { %v695_v31 = vpack.c.bf16 %v411_v21, %v410_v23  ;;  %v715_v32 = vpack.c.bf16 %v419_v22, %v418_v24  ;;  %v358_v33 = vadd.f32 %v610_v48, %v357_v29  ;;  %v398_v34 = vadd.f32 %v610_v48, %v397_v30 }
 0x15b   : > { %v413_v35 = vmax.f32 %v363_v27, 0.0  ;;  %v421_v36 = vmax.f32 %v403_v28, 0.0 }
 0x15c   : > { %730 = vst [vmem:[%s1262_s4 + $0x10] sm:$0xff] %v695_v31   ;;  %734 = vst [vmem:[%s1262_s4 + $0x30] sm:$0xff] %v715_v32   ;;  %v412_v37 = vmax.f32 %v358_v33, 0.0  ;;  %v420_v38 = vmax.f32 %v398_v34, 0.0 }
 0x15e   : > { %v700_v39 = vpack.c.bf16 %v413_v35, %v412_v37  ;;  %v720_v40 = vpack.c.bf16 %v421_v36, %v420_v38 }
 0x160   : > { %731 = vst [vmem:[%s1262_s4 + $0x18] sm:$0xff] %v700_v39   ;;  %735 = vst [vmem:[%s1262_s4 + $0x38] sm:$0xff] %v720_v40  }
 0x161   : > { %1006 = shalt.err (!%p1003_p7)
}
 0x162   : > { %s1007_s30 = scalar_lea.hbm %s1277_s11, 1024  ;;  %s1011_s8 = scalar_lea.hbm %s1326_s3, 2048 }
 0x163   : > { %p1008_p9 = scmp.ne.s32.totalorder %s1277_s11, %s1007_s30  ;;  %p1012_p5 = scmp.lt.u32.totalorder %s1277_s11, %s1326_s3 }
 0x164   : > { %p1013_p11 = scmp.lt.u32.totalorder %s1011_s8, %s1007_s30  ;;  %p1015_p4 = scmp.lt.u32.totalorder %s1007_s30, %s1277_s11 }
 0x165   : > { %p1009_p2 = pnand %p1008_p9, %p1185_p12 }
 0x166   : > { %p1014_p1 = por %p1013_p11, %p1012_p5 }
 0x167   : > { %p1010_p0 = pneg %p1009_p2 }
 0x168   : > { %p1016_p6 = por %p1015_p4, %p1014_p1 }
 0x16a   : > { %p1017_p8 = pnand %p1016_p6, %p1010_p0 }
 0x16c   : > { %1020 = shalt.err (!%p1017_p8)
}
 0x16d   : > { %s1072_s20 = smov 64   ;;  %s1073_s4 = smov 4  }
 0x16e   : > { %878 = dma.vmem_to_hbm [thread:$0]  (%p1185_p12), %s1270_s25, 1024, %s1277_s11, %s503_s16, %s1072_s20, %s1072_s20, %s1073_s4  }
 0x16f PF: > { %s531_s26 = sand.u32 1, %s1051_s12   ;;  %p1341_p10 = scmp.ne.s32.totalorder %s1331_s19, 0 }
 0x170   : > { %p1342_p13 = scmp.ge.s32.totalorder %s1063_s15, 2  ;;  %s532_s5 = scalar_lea.sflag [#allocation4], %s531_s26 }
 0x172   : > { %p889_p3 = pnand %p1342_p13, %p1341_p10 }
 0x174   : > { %1046 = dma.done.wait (!%p889_p3), %s532_s5, 1024  }
 0x175   : > { %1048 = vsyncadd (!%p889_p3), %s532_s5, 4294966272  ;;  %p17_p7 = scmp.ge.s32.totalorder %s1150_s24, 4   ;;  %s1343_s12 = smov %s1055_s13 }
 0x176   : > { %s1344_s13 = smov %s1059_s14  ;;  %s1345_s14 = smov %s1181_s17 }
 0x177   : > { %s1346_s15 = smov %s1150_s24  ;;  %19 = sbr.rel (!%p17_p7) target bundleno = 6 (0x6), region = 81 }
 0x17e   :  { %537 = vsyncpa [#allocation3], 1 }
 0x17f   :  { %539 = vsyncpa [#allocation3 + $0x1], 1 }
 0x180   :  { %540 = vsyncpa [#allocation6], 1 }
 0x181   :  { %541 = vsyncpa [#allocation4], 1 }
 0x182   :  { %543 = vsyncpa [#allocation4 + $0x1], 1 }

</bundles_post_ra>
